<compile_context>
chip_gen: v5e
topology: v5e:2x2
jax: 0.10.0
libtpu: 0.0.40
codegen_flags: <defaults>
</compile_context>

<pallas_src>
import functools

import jax
import jax.numpy as jnp
from jax.experimental import pallas as pl
from jax.experimental.pallas import tpu as pltpu

EPS = 1e-5


def _fused_kernel(x_ref, w1_ref, b1_ref, gamma_ref, beta_ref,
                  w2_ref, b2_ref, w3_ref, b3_ref, o_ref,
                  sum_ref, sq_ref, scale_ref, shift_ref, *, batch, tile_b):
    phase = pl.program_id(0)   # 0: BatchNorm statistics, 1: forward pass
    t = pl.program_id(1)       # batch tile

    @pl.when(jnp.logical_and(phase == 0, t == 0))
    def _init():
        sum_ref[...] = jnp.zeros_like(sum_ref)
        sq_ref[...] = jnp.zeros_like(sq_ref)

    # h1 = relu(W1 @ x + b1) is needed in both phases (recomputed in phase 1;
    # far cheaper than round-tripping a (6, B) activation through HBM).
    x = x_ref[...]                                                     # (15, TB)
    h1 = jnp.maximum(
        jnp.dot(w1_ref[...], x, preferred_element_type=jnp.float32) + b1_ref[...],
        0.0)                                                           # (6, TB)

    @pl.when(phase == 0)
    def _stats():
        # Mask out zero-padded batch columns (batch is a static Python int).
        col = t * tile_b + jax.lax.broadcasted_iota(jnp.int32, (1, tile_b), 1)
        maskf = (col < batch).astype(jnp.float32)                      # (1, TB)
        h1m = h1 * maskf
        sum_ref[...] += jnp.sum(h1m, axis=1, keepdims=True)            # (6, 1)
        sq_ref[...] += jnp.sum(h1m * h1, axis=1, keepdims=True)        # (6, 1)
        o_ref[...] = jnp.zeros_like(o_ref)   # keep the output buffer defined

    @pl.when(jnp.logical_and(phase == 1, t == 0))
    def _finalize_stats():
        inv_b = 1.0 / batch
        mean = sum_ref[...] * inv_b                                    # (6, 1)
        var = jnp.maximum(sq_ref[...] * inv_b - mean * mean, 0.0)      # biased var
        s = gamma_ref[...] * jax.lax.rsqrt(var + EPS)                  # (6, 1)
        scale_ref[...] = s
        shift_ref[...] = beta_ref[...] - mean * s

    @pl.when(phase == 1)
    def _forward():
        hbn = h1 * scale_ref[...] + shift_ref[...]                     # (6, TB)
        h2 = jnp.maximum(
            jnp.dot(w2_ref[...], hbn, preferred_element_type=jnp.float32)
            + b2_ref[...], 0.0)                                        # (3, TB)
        h3 = (jnp.dot(w3_ref[...], h2, preferred_element_type=jnp.float32)
              + b3_ref[...])                                           # (1, TB)
        o_ref[...] = jax.nn.sigmoid(h3)                                # (1, TB)


def three_layer_net(x, params, *, tile_b=512):
    """x: (B, 15) float32 (PyTorch layout).  Returns (B, 1) float32.

    BatchNorm1d is evaluated with training-mode semantics (batch mean,
    biased batch variance, eps=1e-5), matching the module's forward()
    before .eval().
    """
    w1, b1, gamma, beta, w2, b2, w3, b3 = params
    B = x.shape[0]

    # Lane-multiple batch tile; don't over-pad tiny batches.
    tile_b = max(128, min(tile_b, pl.cdiv(B, 128) * 128))
    n_tiles = pl.cdiv(B, tile_b)
    Bp = n_tiles * tile_b

    # Feature-major, zero-padded batch (batch lives in the 128-lane axis).
    x_fm = jnp.pad(x.astype(jnp.float32).T, ((0, 0), (0, Bp - B)))     # (15, Bp)

    flops = 2 * Bp * (2 * 15 * 6 + 6 + 6 * 3 + 3 * 1)
    bytes_accessed = 4 * (2 * 15 * Bp + Bp + 6 * 15 + 4 * 6 + 3 * 6 + 3 + 3 + 1)

    out_fm = pl.pallas_call(
        functools.partial(_fused_kernel, batch=B, tile_b=tile_b),
        out_shape=jax.ShapeDtypeStruct((1, Bp), jnp.float32),
        grid=(2, n_tiles),                       # (phase, batch tile)
        in_specs=[
            pl.BlockSpec((15, tile_b), lambda p, t: (0, t)),   # x tile (streamed)
            pl.BlockSpec((6, 15), lambda p, t: (0, 0)),        # w1 (resident)
            pl.BlockSpec((6, 1), lambda p, t: (0, 0)),         # b1
            pl.BlockSpec((6, 1), lambda p, t: (0, 0)),         # gamma
            pl.BlockSpec((6, 1), lambda p, t: (0, 0)),         # beta
            pl.BlockSpec((3, 6), lambda p, t: (0, 0)),         # w2
            pl.BlockSpec((3, 1), lambda p, t: (0, 0)),         # b2
            pl.BlockSpec((1, 3), lambda p, t: (0, 0)),         # w3
            pl.BlockSpec((1, 1), lambda p, t: (0, 0)),         # b3
        ],
        out_specs=pl.BlockSpec((1, tile_b), lambda p, t: (0, t)),
        scratch_shapes=[
            pltpu.VMEM((6, 1), jnp.float32),   # sum(h1)
            pltpu.VMEM((6, 1), jnp.float32),   # sum(h1^2)
            pltpu.VMEM((6, 1), jnp.float32),   # BN scale  = gamma * rsqrt(var+eps)
            pltpu.VMEM((6, 1), jnp.float32),   # BN shift  = beta - mean * scale
        ],
        compiler_params=pltpu.CompilerParams(
            dimension_semantics=("arbitrary", "arbitrary")),
        cost_estimate=pl.CostEstimate(
            flops=flops, transcendentals=Bp, bytes_accessed=bytes_accessed),
    )(x_fm, w1, b1.reshape(6, 1), gamma.reshape(6, 1), beta.reshape(6, 1),
      w2, b2.reshape(3, 1), w3, b3.reshape(1, 1))

    return out_fm[0, :B].reshape(B, 1)


def init_params(key):
    """Deterministic init mimicking PyTorch defaults (Linear: U(+/-1/sqrt(fan_in)),
    BatchNorm1d: weight=1, bias=0). Weights kept in PyTorch (out, in) layout."""
    ks = jax.random.split(key, 6)

    def lin(kw, kb, fan_in, fan_out):
        bound = 1.0 / jnp.sqrt(fan_in)
        w = jax.random.uniform(kw, (fan_out, fan_in), jnp.float32, -bound, bound)
        b = jax.random.uniform(kb, (fan_out,), jnp.float32, -bound, bound)
        return w, b

    w1, b1 = lin(ks[0], ks[1], 15, 6)
    w2, b2 = lin(ks[2], ks[3], 6, 3)
    w3, b3 = lin(ks[4], ks[5], 3, 1)
    gamma = jnp.ones((6,), jnp.float32)
    beta = jnp.zeros((6,), jnp.float32)
    return (w1, b1, gamma, beta, w2, b2, w3, b3)


def reference(x, params):
    """Pure-JAX reference of the same forward pass (PyTorch semantics)."""
    w1, b1, gamma, beta, w2, b2, w3, b3 = params
    h1 = jnp.maximum(x @ w1.T + b1, 0.0)
    mean = h1.mean(axis=0)
    var = ((h1 - mean) ** 2).mean(axis=0)          # biased, training-mode BN
    hbn = (h1 - mean) / jnp.sqrt(var + EPS) * gamma + beta
    h2 = jnp.maximum(hbn @ w2.T + b2, 0.0)
    return jax.nn.sigmoid(h2 @ w3.T + b3)


# TODO(synk): BatchNorm running_mean/running_var momentum updates (training-side
# bookkeeping) are not implemented; only the forward normalization is computed.

if __name__ == "__main__":
    key = jax.random.PRNGKey(0)
    kx, kx2, kp = jax.random.split(key, 3)
    params = init_params(kp)

    # Small batch (single tile path: one kernel launch, x read from HBM once).
    B = 8
    x = jax.random.normal(kx, (B, 15), jnp.float32)
    out = jax.block_until_ready(three_layer_net(x, params))
    ref = reference(x, params)
    assert out.shape == (B, 1)
    assert jnp.allclose(out, ref, atol=1e-4, rtol=1e-4), (out, ref)

    # Larger ragged batch (multi-tile path: streamed tiles + padding mask).
    B2 = 200
    x2 = jax.random.normal(kx2, (B2, 15), jnp.float32)
    out2 = jax.block_until_ready(three_layer_net(x2, params, tile_b=128))
    ref2 = reference(x2, params)
    assert out2.shape == (B2, 1)
    assert jnp.allclose(out2, ref2, atol=1e-4, rtol=1e-4), (out2, ref2)

    print("KERNEL_OK")
</pallas_src>

<mosaic_0001>
module attributes {stable_mosaic.version = 11 : i64} {
  func.func @_fused_kernel(%arg0: i32, %arg1: i32, %arg2: memref<15x128xf32, #tpu.memory_space<vmem>>, %arg3: memref<6x15xf32, #tpu.memory_space<vmem>>, %arg4: memref<6x1xf32, #tpu.memory_space<vmem>>, %arg5: memref<6x1xf32, #tpu.memory_space<vmem>>, %arg6: memref<6x1xf32, #tpu.memory_space<vmem>>, %arg7: memref<3x6xf32, #tpu.memory_space<vmem>>, %arg8: memref<3x1xf32, #tpu.memory_space<vmem>>, %arg9: memref<1x3xf32, #tpu.memory_space<vmem>>, %arg10: memref<1x1xf32, #tpu.memory_space<vmem>>, %arg11: memref<1x128xf32, #tpu.memory_space<vmem>>, %arg12: memref<6x1xf32, #tpu.memory_space<vmem>>, %arg13: memref<6x1xf32, #tpu.memory_space<vmem>>, %arg14: memref<6x1xf32, #tpu.memory_space<vmem>>, %arg15: memref<6x1xf32, #tpu.memory_space<vmem>>) attributes {dimension_semantics = [#tpu.dimension_semantics<arbitrary>, #tpu.dimension_semantics<arbitrary>], iteration_bounds = array<i64: 2, 1>, scalar_prefetch = 0 : i64, scratch_operands = 4 : i64, tpu.core_type = #tpu.core_type<tc>, window_params = [{transform_indices = @transform_0, window_bounds = array<i64: 15, 128>}, {pipeline_mode = #tpu.pipeline_mode<synchronous>, transform_indices = @transform_1, window_bounds = array<i64: 6, 15>}, {pipeline_mode = #tpu.pipeline_mode<synchronous>, transform_indices = @transform_2, window_bounds = array<i64: 6, 1>}, {pipeline_mode = #tpu.pipeline_mode<synchronous>, transform_indices = @transform_3, window_bounds = array<i64: 6, 1>}, {pipeline_mode = #tpu.pipeline_mode<synchronous>, transform_indices = @transform_4, window_bounds = array<i64: 6, 1>}, {pipeline_mode = #tpu.pipeline_mode<synchronous>, transform_indices = @transform_5, window_bounds = array<i64: 3, 6>}, {pipeline_mode = #tpu.pipeline_mode<synchronous>, transform_indices = @transform_6, window_bounds = array<i64: 3, 1>}, {pipeline_mode = #tpu.pipeline_mode<synchronous>, transform_indices = @transform_7, window_bounds = array<i64: 1, 3>}, {pipeline_mode = #tpu.pipeline_mode<synchronous>, transform_indices = @transform_8, window_bounds = array<i64: 1, 1>}, {transform_indices = @transform_9, window_bounds = array<i64: 1, 128>}]} {
    %c0_i32 = arith.constant 0 : i32
    %0 = arith.cmpi eq, %arg0, %c0_i32 : i32
    %c0_i32_0 = arith.constant 0 : i32
    %1 = arith.cmpi eq, %arg1, %c0_i32_0 : i32
    %2 = arith.andi %0, %1 : i1
    %3 = arith.extui %2 : i1 to i32
    %c0_i32_1 = arith.constant 0 : i32
    %4 = arith.cmpi ne, %3, %c0_i32_1 : i32
    scf.if %4 {
      %cst_14 = arith.constant 0.000000e+00 : f32
      %24 = vector.broadcast %cst_14 : f32 to vector<6x1xf32>
      %c0_15 = arith.constant 0 : index
      %c0_16 = arith.constant 0 : index
      %25 = vector.load %arg12[%c0_15, %c0_16] : memref<6x1xf32, #tpu.memory_space<vmem>>, vector<6x1xf32>
      tpu.vector_store %arg12[%c0_15, %c0_16], %24 {strides = array<i32>} : memref<6x1xf32, #tpu.memory_space<vmem>>, vector<6x1xf32>,
      %cst_17 = arith.constant 0.000000e+00 : f32
      %26 = vector.broadcast %cst_17 : f32 to vector<6x1xf32>
      %c0_18 = arith.constant 0 : index
      %c0_19 = arith.constant 0 : index
      %27 = vector.load %arg13[%c0_18, %c0_19] : memref<6x1xf32, #tpu.memory_space<vmem>>, vector<6x1xf32>
      tpu.vector_store %arg13[%c0_18, %c0_19], %26 {strides = array<i32>} : memref<6x1xf32, #tpu.memory_space<vmem>>, vector<6x1xf32>,
    } else {
    }
    %c0 = arith.constant 0 : index
    %c0_2 = arith.constant 0 : index
    %5 = vector.load %arg2[%c0, %c0_2] : memref<15x128xf32, #tpu.memory_space<vmem>>, vector<15x128xf32>
    %c0_3 = arith.constant 0 : index
    %c0_4 = arith.constant 0 : index
    %6 = vector.load %arg3[%c0_3, %c0_4] : memref<6x15xf32, #tpu.memory_space<vmem>>, vector<6x15xf32>
    %cst = arith.constant dense<0.000000e+00> : vector<6x128xf32>
    %7 = tpu.matmul %6, %5, %cst {dimension_numbers = #tpu.dot_dimension_numbers<[1], [0], [0], [1], [0, 0, 1, 1], [], []>} : vector<6x15xf32>, vector<15x128xf32>, vector<6x128xf32> -> vector<6x128xf32>
    %c0_5 = arith.constant 0 : index
    %c0_6 = arith.constant 0 : index
    %8 = vector.load %arg4[%c0_5, %c0_6] : memref<6x1xf32, #tpu.memory_space<vmem>>, vector<6x1xf32>
    %9 = vector.broadcast %8 : vector<6x1xf32> to vector<6x128xf32>
    %10 = arith.addf %7, %9 : vector<6x128xf32>
    %cst_7 = arith.constant 0.000000e+00 : f32
    %11 = vector.broadcast %cst_7 : f32 to vector<6x128xf32>
    %12 = arith.maximumf %10, %11 : vector<6x128xf32>
    %c0_i32_8 = arith.constant 0 : i32
    %13 = arith.cmpi eq, %arg0, %c0_i32_8 : i32
    %14 = arith.extui %13 : i1 to i32
    %c0_i32_9 = arith.constant 0 : i32
    %15 = arith.cmpi ne, %14, %c0_i32_9 : i32
    scf.if %15 {
      %c128_i32 = arith.constant 128 : i32
      %24 = arith.muli %arg1, %c128_i32 : i32
      %25 = tpu.iota {dimensions = array<i32: 1>} : vector<1x128xi32>
      %26 = vector.broadcast %24 : i32 to vector<1x128xi32>
      %27 = arith.addi %26, %25 : vector<1x128xi32>
      %c8_i32 = arith.constant 8 : i32
      %28 = vector.broadcast %c8_i32 : i32 to vector<1x128xi32>
      %29 = arith.cmpi slt, %27, %28 : vector<1x128xi32>
      %30 = arith.extui %29 : vector<1x128xi1> to vector<1x128xi32>
      %31 = arith.sitofp %30 : vector<1x128xi32> to vector<1x128xf32>
      %32 = vector.broadcast %31 : vector<1x128xf32> to vector<6x128xf32>
      %33 = arith.mulf %12, %32 : vector<6x128xf32>
      %c0_14 = arith.constant 0 : index
      %c0_15 = arith.constant 0 : index
      %34 = vector.load %arg12[%c0_14, %c0_15] : memref<6x1xf32, #tpu.memory_space<vmem>>, vector<6x1xf32>
      %cst_16 = arith.constant dense<0.000000e+00> : vector<6xf32>
      %35 = vector.multi_reduction <add>, %33, %cst_16 [1] : vector<6x128xf32> to vector<6xf32>
      %36 = vector.shape_cast %35 : vector<6xf32> to vector<6x1xf32>
      %37 = arith.addf %34, %36 : vector<6x1xf32>
      %c0_17 = arith.constant 0 : index
      %c0_18 = arith.constant 0 : index
      %38 = vector.load %arg12[%c0_17, %c0_18] : memref<6x1xf32, #tpu.memory_space<vmem>>, vector<6x1xf32>
      tpu.vector_store %arg12[%c0_17, %c0_18], %37 {strides = array<i32>} : memref<6x1xf32, #tpu.memory_space<vmem>>, vector<6x1xf32>,
      %c0_19 = arith.constant 0 : index
      %c0_20 = arith.constant 0 : index
      %39 = vector.load %arg13[%c0_19, %c0_20] : memref<6x1xf32, #tpu.memory_space<vmem>>, vector<6x1xf32>
      %40 = arith.mulf %33, %12 : vector<6x128xf32>
      %cst_21 = arith.constant dense<0.000000e+00> : vector<6xf32>
      %41 = vector.multi_reduction <add>, %40, %cst_21 [1] : vector<6x128xf32> to vector<6xf32>
      %42 = vector.shape_cast %41 : vector<6xf32> to vector<6x1xf32>
      %43 = arith.addf %39, %42 : vector<6x1xf32>
      %c0_22 = arith.constant 0 : index
      %c0_23 = arith.constant 0 : index
      %44 = vector.load %arg13[%c0_22, %c0_23] : memref<6x1xf32, #tpu.memory_space<vmem>>, vector<6x1xf32>
      tpu.vector_store %arg13[%c0_22, %c0_23], %43 {strides = array<i32>} : memref<6x1xf32, #tpu.memory_space<vmem>>, vector<6x1xf32>,
      %cst_24 = arith.constant 0.000000e+00 : f32
      %45 = vector.broadcast %cst_24 : f32 to vector<1x128xf32>
      %c0_25 = arith.constant 0 : index
      %c0_26 = arith.constant 0 : index
      %46 = vector.load %arg11[%c0_25, %c0_26] : memref<1x128xf32, #tpu.memory_space<vmem>>, vector<1x128xf32>
      tpu.vector_store %arg11[%c0_25, %c0_26], %45 {strides = array<i32>} : memref<1x128xf32, #tpu.memory_space<vmem>>, vector<1x128xf32>,
    } else {
    }
    %c1_i32 = arith.constant 1 : i32
    %16 = arith.cmpi eq, %arg0, %c1_i32 : i32
    %c0_i32_10 = arith.constant 0 : i32
    %17 = arith.cmpi eq, %arg1, %c0_i32_10 : i32
    %18 = arith.andi %16, %17 : i1
    %19 = arith.extui %18 : i1 to i32
    %c0_i32_11 = arith.constant 0 : i32
    %20 = arith.cmpi ne, %19, %c0_i32_11 : i32
    scf.if %20 {
      %c0_14 = arith.constant 0 : index
      %c0_15 = arith.constant 0 : index
      %24 = vector.load %arg12[%c0_14, %c0_15] : memref<6x1xf32, #tpu.memory_space<vmem>>, vector<6x1xf32>
      %cst_16 = arith.constant 1.250000e-01 : f32
      %25 = vector.broadcast %cst_16 : f32 to vector<6x1xf32>
      %26 = arith.mulf %24, %25 : vector<6x1xf32>
      %c0_17 = arith.constant 0 : index
      %c0_18 = arith.constant 0 : index
      %27 = vector.load %arg13[%c0_17, %c0_18] : memref<6x1xf32, #tpu.memory_space<vmem>>, vector<6x1xf32>
      %cst_19 = arith.constant 1.250000e-01 : f32
      %28 = vector.broadcast %cst_19 : f32 to vector<6x1xf32>
      %29 = arith.mulf %27, %28 : vector<6x1xf32>
      %30 = arith.mulf %26, %26 : vector<6x1xf32>
      %31 = arith.subf %29, %30 : vector<6x1xf32>
      %cst_20 = arith.constant 0.000000e+00 : f32
      %32 = vector.broadcast %cst_20 : f32 to vector<6x1xf32>
      %33 = arith.maximumf %31, %32 : vector<6x1xf32>
      %c0_21 = arith.constant 0 : index
      %c0_22 = arith.constant 0 : index
      %34 = vector.load %arg5[%c0_21, %c0_22] : memref<6x1xf32, #tpu.memory_space<vmem>>, vector<6x1xf32>
      %cst_23 = arith.constant 9.99999974E-6 : f32
      %35 = vector.broadcast %cst_23 : f32 to vector<6x1xf32>
      %36 = arith.addf %33, %35 : vector<6x1xf32>
      %37 = math.rsqrt %36 : vector<6x1xf32>
      %38 = arith.mulf %34, %37 : vector<6x1xf32>
      %c0_24 = arith.constant 0 : index
      %c0_25 = arith.constant 0 : index
      %39 = vector.load %arg14[%c0_24, %c0_25] : memref<6x1xf32, #tpu.memory_space<vmem>>, vector<6x1xf32>
      tpu.vector_store %arg14[%c0_24, %c0_25], %38 {strides = array<i32>} : memref<6x1xf32, #tpu.memory_space<vmem>>, vector<6x1xf32>,
      %c0_26 = arith.constant 0 : index
      %c0_27 = arith.constant 0 : index
      %40 = vector.load %arg6[%c0_26, %c0_27] : memref<6x1xf32, #tpu.memory_space<vmem>>, vector<6x1xf32>
      %41 = arith.mulf %26, %38 : vector<6x1xf32>
      %42 = arith.subf %40, %41 : vector<6x1xf32>
      %c0_28 = arith.constant 0 : index
      %c0_29 = arith.constant 0 : index
      %43 = vector.load %arg15[%c0_28, %c0_29] : memref<6x1xf32, #tpu.memory_space<vmem>>, vector<6x1xf32>
      tpu.vector_store %arg15[%c0_28, %c0_29], %42 {strides = array<i32>} : memref<6x1xf32, #tpu.memory_space<vmem>>, vector<6x1xf32>,
    } else {
    }
    %c1_i32_12 = arith.constant 1 : i32
    %21 = arith.cmpi eq, %arg0, %c1_i32_12 : i32
    %22 = arith.extui %21 : i1 to i32
    %c0_i32_13 = arith.constant 0 : i32
    %23 = arith.cmpi ne, %22, %c0_i32_13 : i32
    scf.if %23 {
      %c0_14 = arith.constant 0 : index
      %c0_15 = arith.constant 0 : index
      %24 = vector.load %arg14[%c0_14, %c0_15] : memref<6x1xf32, #tpu.memory_space<vmem>>, vector<6x1xf32>
      %25 = vector.broadcast %24 : vector<6x1xf32> to vector<6x128xf32>
      %26 = arith.mulf %12, %25 : vector<6x128xf32>
      %c0_16 = arith.constant 0 : index
      %c0_17 = arith.constant 0 : index
      %27 = vector.load %arg15[%c0_16, %c0_17] : memref<6x1xf32, #tpu.memory_space<vmem>>, vector<6x1xf32>
      %28 = vector.broadcast %27 : vector<6x1xf32> to vector<6x128xf32>
      %29 = arith.addf %26, %28 : vector<6x128xf32>
      %c0_18 = arith.constant 0 : index
      %c0_19 = arith.constant 0 : index
      %30 = vector.load %arg7[%c0_18, %c0_19] : memref<3x6xf32, #tpu.memory_space<vmem>>, vector<3x6xf32>
      %cst_20 = arith.constant dense<0.000000e+00> : vector<3x128xf32>
      %31 = tpu.matmul %30, %29, %cst_20 {dimension_numbers = #tpu.dot_dimension_numbers<[1], [0], [0], [1], [0, 0, 1, 1], [], []>} : vector<3x6xf32>, vector<6x128xf32>, vector<3x128xf32> -> vector<3x128xf32>
      %c0_21 = arith.constant 0 : index
      %c0_22 = arith.constant 0 : index
      %32 = vector.load %arg8[%c0_21, %c0_22] : memref<3x1xf32, #tpu.memory_space<vmem>>, vector<3x1xf32>
      %33 = vector.broadcast %32 : vector<3x1xf32> to vector<3x128xf32>
      %34 = arith.addf %31, %33 : vector<3x128xf32>
      %cst_23 = arith.constant 0.000000e+00 : f32
      %35 = vector.broadcast %cst_23 : f32 to vector<3x128xf32>
      %36 = arith.maximumf %34, %35 : vector<3x128xf32>
      %c0_24 = arith.constant 0 : index
      %c0_25 = arith.constant 0 : index
      %37 = vector.load %arg9[%c0_24, %c0_25] : memref<1x3xf32, #tpu.memory_space<vmem>>, vector<1x3xf32>
      %cst_26 = arith.constant dense<0.000000e+00> : vector<1x128xf32>
      %38 = tpu.matmul %37, %36, %cst_26 {dimension_numbers = #tpu.dot_dimension_numbers<[1], [0], [0], [1], [0, 0, 1, 1], [], []>} : vector<1x3xf32>, vector<3x128xf32>, vector<1x128xf32> -> vector<1x128xf32>
      %c0_27 = arith.constant 0 : index
      %c0_28 = arith.constant 0 : index
      %39 = vector.load %arg10[%c0_27, %c0_28] : memref<1x1xf32, #tpu.memory_space<vmem>>, vector<1x1xf32>
      %40 = vector.broadcast %39 : vector<1x1xf32> to vector<1x128xf32>
      %41 = arith.addf %38, %40 : vector<1x128xf32>
      %42 = arith.negf %41 : vector<1x128xf32>
      %43 = math.exp %42 : vector<1x128xf32>
      %cst_29 = arith.constant 1.000000e+00 : f32
      %44 = vector.broadcast %cst_29 : f32 to vector<1x128xf32>
      %45 = arith.addf %44, %43 : vector<1x128xf32>
      %46 = arith.divf %44, %45 : vector<1x128xf32>
      %c0_30 = arith.constant 0 : index
      %c0_31 = arith.constant 0 : index
      %47 = vector.load %arg11[%c0_30, %c0_31] : memref<1x128xf32, #tpu.memory_space<vmem>>, vector<1x128xf32>
      tpu.vector_store %arg11[%c0_30, %c0_31], %46 {strides = array<i32>} : memref<1x128xf32, #tpu.memory_space<vmem>>, vector<1x128xf32>,
    } else {
    }
    return
  }
  func.func @transform_0(%arg0: i32, %arg1: i32) -> (i32, i32) {
    %c0_i32 = arith.constant 0 : i32
    %c0_i32_0 = arith.constant 0 : i32
    return %c0_i32, %arg1 : i32, i32
  }
  func.func @transform_1(%arg0: i32, %arg1: i32) -> (i32, i32) {
    %c0_i32 = arith.constant 0 : i32
    %c0_i32_0 = arith.constant 0 : i32
    %c0_i32_1 = arith.constant 0 : i32
    return %c0_i32, %c0_i32_0 : i32, i32
  }
  func.func @transform_2(%arg0: i32, %arg1: i32) -> (i32, i32) {
    %c0_i32 = arith.constant 0 : i32
    %c0_i32_0 = arith.constant 0 : i32
    %c0_i32_1 = arith.constant 0 : i32
    return %c0_i32, %c0_i32_0 : i32, i32
  }
  func.func @transform_3(%arg0: i32, %arg1: i32) -> (i32, i32) {
    %c0_i32 = arith.constant 0 : i32
    %c0_i32_0 = arith.constant 0 : i32
    %c0_i32_1 = arith.constant 0 : i32
    return %c0_i32, %c0_i32_0 : i32, i32
  }
  func.func @transform_4(%arg0: i32, %arg1: i32) -> (i32, i32) {
    %c0_i32 = arith.constant 0 : i32
    %c0_i32_0 = arith.constant 0 : i32
    %c0_i32_1 = arith.constant 0 : i32
    return %c0_i32, %c0_i32_0 : i32, i32
  }
  func.func @transform_5(%arg0: i32, %arg1: i32) -> (i32, i32) {
    %c0_i32 = arith.constant 0 : i32
    %c0_i32_0 = arith.constant 0 : i32
    %c0_i32_1 = arith.constant 0 : i32
    return %c0_i32, %c0_i32_0 : i32, i32
  }
  func.func @transform_6(%arg0: i32, %arg1: i32) -> (i32, i32) {
    %c0_i32 = arith.constant 0 : i32
    %c0_i32_0 = arith.constant 0 : i32
    %c0_i32_1 = arith.constant 0 : i32
    return %c0_i32, %c0_i32_0 : i32, i32
  }
  func.func @transform_7(%arg0: i32, %arg1: i32) -> (i32, i32) {
    %c0_i32 = arith.constant 0 : i32
    %c0_i32_0 = arith.constant 0 : i32
    %c0_i32_1 = arith.constant 0 : i32
    return %c0_i32, %c0_i32_0 : i32, i32
  }
  func.func @transform_8(%arg0: i32, %arg1: i32) -> (i32, i32) {
    %c0_i32 = arith.constant 0 : i32
    %c0_i32_0 = arith.constant 0 : i32
    %c0_i32_1 = arith.constant 0 : i32
    return %c0_i32, %c0_i32_0 : i32, i32
  }
  func.func @transform_9(%arg0: i32, %arg1: i32) -> (i32, i32) {
    %c0_i32 = arith.constant 0 : i32
    %c0_i32_0 = arith.constant 0 : i32
    return %c0_i32, %arg1 : i32, i32
  }
}

</mosaic_0001>

<bundles_post_ra>
// kernel: tpu_custom_call.1
= control target key start
LH: loop header
LB: loop body
LE: loop exit
PB: predicated region body
PF: predicated region fallthrough
CT: control target
= control target key end

     0   :  { %s863_s0 = inlined_call_operand.vmem [shape: f32[15,128], index: 0, kind: input, shape index: {}]   ;;  %s864_s1 = inlined_call_operand.vmem [shape: f32[6,15], index: 1, kind: input, shape index: {}]   ;;  %s865_s2 = inlined_call_operand.vmem [shape: f32[6,1], index: 2, kind: input, shape index: {}]   ;;  %s866_s3 = inlined_call_operand.vmem [shape: f32[6,1], index: 3, kind: input, shape index: {}]   ;;  %s867_s4 = inlined_call_operand.vmem [shape: f32[6,1], index: 4, kind: input, shape index: {}]   ;;  %s868_s5 = inlined_call_operand.vmem [shape: f32[3,6], index: 5, kind: input, shape index: {}]   ;;  %s869_s6 = inlined_call_operand.vmem [shape: f32[3,1], index: 6, kind: input, shape index: {}]   ;;  %s870_s7 = inlined_call_operand.vmem [shape: f32[1,3], index: 7, kind: input, shape index: {}]   ;;  %s871_s8 = inlined_call_operand.<no memory space> [shape: f32[1,1], index: 8, kind: input, shape index: {}]   ;;  %s872_s9 = inlined_call_operand.hbm [shape: f32[1,128], index: 9, kind: output, shape index: {}]  }
   0x1   :  { %v14_v0 = vstv %s871_s8 }
   0x2   :  { %15 = vst [vmem:[#allocation6] sm:$0x1] %v14_v0 }
   0x3   :  { %16 = vsyncpa [#allocation8], 0  ;;  %s792_s11 = smov 0   ;;  %s794_s12 = smov 0  }
   0x4   :  { %s796_s13 = smov 0  }
   0x5 LB: > { %s612_s8 = sadd.s32 4294967295, %s732_s13   ;;  %s34_s14 = sadd.s32 1, %s728_s12  ;;  %s732_s13 = sphi %s796_s13, %s22_s13   ;;  %s728_s12 = sphi %s794_s12, %s874_s12   ;;  %s724_s11 = sphi %s792_s11, %s873_s11  }
   0x6   : > { %p36_p0 = scmp.ge.s32.totalorder %s34_s14, 2  ;;  %p615_p1 = scmp.ge.s32.totalorder %s732_s13, 1 }
   0x7   : > { %p301_p2 = scmp.lt.s32.totalorder %s732_s13, 3 }
   0x8   : > { %s876_s14 = smov (%p36_p0, %s34_s14), 0 }
   0x9   : > { %p302_p3 = pnand %p615_p1, %p301_p2 }
   0xa   : > { %p335_p4 = scmp.eq.s32.totalorder (!%p302_p3), %s724_s11, 0 }
   0xb   : > { %305 = sbr.rel (%p302_p3) target bundleno = 759 (0x2f7), region = 56 }
  0x10   : > { %340 = sbr.rel (!%p335_p4) target bundleno = 21 (0x15), region = 60  ;;  %vm341_vm0 = vcmask (%p335_p4), 5120   ;;  %v734_v1 = vmov (%p335_p4), 0.0  }
  0x11   : > { %342 = vst.msk [vmem:[#allocation2] sm:$0x3f] (%p335_p4), %vm341_vm0, %v734_v1 }
  0x12   : > { %343 = vst.msk [vmem:[#allocation3] sm:$0x3f] (%p335_p4), %vm341_vm0, %v734_v1 }
  0x15 PF: > { %v345_v2 = vld [vmem:[%s863_s0 + $0x8] sm:$0x7f]  ;;  %vm357_vm1 = vcmask 1046528   ;;  %v344_v3 = vld [vmem:[%s863_s0] sm:$0xff]  ;;  %vm353_vm2 = vcmask 121856   ;;  %v735_v6 = vmov 0  }
  0x16   : > { %617 = vmatpush.msk.msra.mxu0 %vm357_vm1, %v345_v2  ;;  %v346_v4 = vld [vmem:[%s864_s1] sm:$0x3f]  ;;  %669 = vset.pattern.permute.xlu0 %v735_v6  ;;  %p619_p5 = scmp.ne.s32.totalorder %s724_s11, 0 }
  0x17   : > { %v347_v5 = vld [vmem:[%s865_s2] sm:$0x3f] }
  0x18   : > { %376 = vmatpush.msra.mxu0 %v344_v3  ;;  %350 = vperm.xlu0 %669, %v347_v5  }
  0x19   : > { %618 = vmatmul.msk.f32.vlgmr.msra.gmra.mxu0 %vm353_vm2, %v346_v4 }
  0x8a   : > { %v351_v7 = vpop.permute.xlu0 %350 }
  0x95   : > { %384 = sbr.rel (%p619_p5) target bundleno = 290 (0x122), region = 64 }
  0x96   : > { %v378_v8 = vpop.f32.mrf.mxu0 }
  0x97   : > { %v379_v9 = vadd.f32 %v378_v8, %v351_v7 }
  0x99   : > { %v826_v10 = vmax.f32 %v379_v9, 0.0 }
  0x9a   : > { %v386_v11 = vlaneseq  ;;  %v736_v12 = vmov 0.0   ;;  %vm395_vm4 = vcmask 1045504   ;;  %v394_v19 = vld [vmem:[#allocation2] sm:$0x3f]  ;;  %vm400_vm5 = vcmask 5120  }
  0x9b   : > { %409 = vst [vmem:[#allocation7] sm:$0x1] %v736_v12  ;;  %v402_v22 = vld [vmem:[#allocation3] sm:$0x3f] }
  0x9c   : > { %v387_v13 = vand.u32 127, %v386_v11 }
  0x9e   : > { %vm390_vm3 = vcmp.lt.s32.totalorder %v387_v13, 8 }
  0x9f   : > { %v620_v14 = vsel %vm390_vm3, 1.0, %v736_v12 }
  0xa0   : > { %v393_v15 = vmul.f32 %v620_v14, %v826_v10 }
  0xa2   : > { %v396_v16 = vsel %vm395_vm4, %v393_v15, 0.0  ;;  %v403_v17 = vmul.f32 %v393_v15, %v826_v10 }
  0xa3   : > { %397 = vadd.xlane.f32.xlu0 %v396_v16 }
  0xa4   : > { %v404_v18 = vsel %vm395_vm4, %v403_v17, 0.0 }
  0xab   : > { %405 = vadd.xlane.f32.xlu0 %v404_v18 }
 0x116   : > { %v398_v20 = vpop.xlane.xlu0 %397 }
 0x117   : > { %v399_v21 = vadd.f32 %v398_v20, %v394_v19 }
 0x119   : > { %401 = vst.msk [vmem:[#allocation2] sm:$0x3f] %vm400_vm5, %v399_v21 }
 0x11e   : > { %v406_v23 = vpop.xlane.xlu0 %405 }
 0x11f   : > { %v407_v24 = vadd.f32 %v406_v23, %v402_v22 }
 0x121   : > { %408 = vst.msk [vmem:[#allocation3] sm:$0x3f] %vm400_vm5, %v407_v24 }
 0x122 PF: > { %p410_p6 = scmp.eq.s32.totalorder %s724_s11, 1 }
 0x123   : > { %v415_v25 = vld [vmem:[#allocation2] sm:$0x3f] (%p410_p6)  ;;  %vm435_vm9 = vcmask (%p410_p6), 5120  }
 0x124   : > { %414 = sbr.rel (!%p410_p6) target bundleno = 330 (0x14a), region = 68  ;;  %v416_v27 = vmul.f32 (%p410_p6), 0.125, %v415_v25  ;;  %v422_v38 = vld [vmem:[%s866_s3] sm:$0x3f] (%p410_p6) }
 0x125   : > { %v437_v42 = vld [vmem:[%s867_s4] sm:$0x3f] (%p410_p6) }
 0x126   : > { %v419_v29 = vmul.f32 (%p410_p6), %v416_v27, %v416_v27 }
 0x128   : > { %v417_v26 = vld [vmem:[#allocation3] sm:$0x3f] (%p410_p6) }
 0x129   : > { %v418_v28 = vmul.f32 0.125, %v417_v26 }
 0x12b   : > { %v420_v30 = vsub.f32 %v418_v28, %v419_v29 }
 0x12d   : > { %v421_v31 = vmax.f32 %v420_v30, 0.0 }
 0x12f   : > { %v423_v32 = vadd.f32 1e-05, %v421_v31 }
 0x131   : > { %670 = vrsqrt.f32 %v423_v32  ;;  %vm430_vm6 = vweird.f32 %v423_v32 }
 0x137   : > { %v671_v33 = vpop.eup %670 }
 0x138   : > { %v425_v34 = vmul.f32 %v671_v33, %v423_v32  ;;  %vm431_vm7 = vweird.f32 %v671_v33 }
 0x139   : > { %vm432_vm8 = vmor %vm430_vm6, %vm431_vm7 }
 0x13a   : > { %v426_v35 = vmul.f32 %v671_v33, %v425_v34 }
 0x13c   : > { %v427_v36 = vmul.f32 0.5, %v426_v35 }
 0x13e   : > { %v428_v37 = vsub.f32 1.5, %v427_v36 }
 0x140   : > { %v429_v39 = vmul.f32 %v671_v33, %v428_v37 }
 0x142   : > { %v433_v40 = vsel %vm432_vm8, %v671_v33, %v429_v39 }
 0x143   : > { %v434_v41 = vmul.f32 %v433_v40, %v422_v38 }
 0x145   : > { %436 = vst.msk [vmem:[#allocation4] sm:$0x3f] %vm435_vm9, %v434_v41  ;;  %v438_v43 = vmul.f32 %v434_v41, %v416_v27 }
 0x147   : > { %v439_v44 = vsub.f32 %v437_v42, %v438_v43 }
 0x149   : > { %440 = vst.msk [vmem:[#allocation5] sm:$0x3f] %vm435_vm9, %v439_v44 }
 0x14a PF: > { %p622_p7 = scmp.ne.s32.totalorder %s724_s11, 1 }
 0x14c   : > { %443 = sbr.rel (%p622_p7) target bundleno = 753 (0x2f1), region = 72 }
 0x151   : > { %v444_v45 = vld [vmem:[#allocation4] sm:$0x3f]  ;;  %v737_v46 = vmov 0   ;;  %v451_v47 = vld [vmem:[#allocation5] sm:$0x3f]  ;;  %vm469_vm10 = vcmask 1045504  }
 0x152   : > { %672 = vset.pattern.permute.xlu0 %v737_v46  ;;  %673 = vset.pattern.permute.xlu1 %v737_v46  ;;  %v459_v48 = vld [vmem:[%s869_s6] sm:$0x7]  ;;  %vm465_vm11 = vcmask 48128   ;;  %vm506_vm12 = vcmask 1042432   ;;  %vm502_vm13 = vcmask 23552  }
 0x153   : > { %447 = vperm.xlu0 %672, %v444_v45   ;;  %462 = vperm.xlu1 %673, %v459_v48   ;;  %v495_v49 = vld [vmem:[#allocation6] sm:$0x1] }
 0x154   : > { %v458_v54 = vld [vmem:[%s868_s5] sm:$0x7] }
 0x155   : > { %v494_v59 = vld [vmem:[%s870_s7] sm:$0x1] }
 0x15b   : > { %454 = vperm.xlu0 %672, %v451_v47   ;;  %498 = vperm.xlu1 %673, %v495_v49  }
 0x1c5   : > { %v448_v50 = vpop.permute.xlu0 %447  ;;  %v463_v55 = vpop.permute.xlu1 %462 }
 0x1c6   : > { %v450_v51 = vmul.f32 %v448_v50, %v826_v10 }
 0x1cd   : > { %v455_v52 = vpop.permute.xlu0 %454  ;;  %v499_v60 = vpop.permute.xlu1 %498 }
 0x1ce   : > { %v457_v53 = vadd.f32 %v455_v52, %v450_v51  ;;  %v501_v61 = vperm.slane %v499_v60, 0 }
 0x1d0   : > { %623 = vmatpush.msk.msra.mxu0 %vm469_vm10, %v457_v53 }
 0x1d1   : > { %624 = vmatmul.msk.f32.vlgmr.msra.gmra.mxu0 %vm465_vm11, %v458_v54 }
 0x24e   : > { %v490_v56 = vpop.f32.mrf.mxu0 }
 0x24f   : > { %v491_v57 = vadd.f32 %v490_v56, %v463_v55 }
 0x251   : > { %v493_v58 = vmax.f32 %v491_v57, 0.0 }
 0x253   : > { %625 = vmatpush.msk.msra.mxu1 %vm506_vm12, %v493_v58 }
 0x254   : > { %626 = vmatmul.msk.f32.vlgmr.msra.gmra.mxu1 %vm502_vm13, %v494_v59 }
 0x2d1   : > { %v527_v62 = vpop.f32.mrf.mxu1 }
 0x2d2   : > { %v528_v63 = vadd.f32 %v527_v62, %v501_v61 }
 0x2d4   : > { %v627_v0 = vmul.f32 -1.442695, %v528_v63 }
 0x2d6   : > { %674 = vpow2.f32 %v627_v0 }
 0x2dc   : > { %v675_v1 = vpop.eup %674 }
 0x2dd   : > { %v533_v2 = vadd.f32 1.0, %v675_v1 }
 0x2df   : > { %676 = vrcp.f32 %v533_v2  ;;  %v545_v6 = vand.u32 2147483648, %v533_v2  ;;  %v543_v8 = vand.u32 2147483647, %v533_v2  ;;  %vm539_vm15 = vweird.f32 %v533_v2 }
 0x2e1   : > { %v546_v10 = vor.u32 1.1754944e-38, %v545_v6  ;;  %vm544_vm1 = vcmp.eq.f32.partialorder %v543_v8, 8.507059e+37 }
 0x2e5   : > { %v677_v3 = vpop.eup %676 }
 0x2e6   : > { %v535_v4 = vmul.f32 %v677_v3, %v533_v2  ;;  %vm540_vm14 = vweird.f32 %v677_v3 }
 0x2e7   : > { %vm541_vm0 = vmor %vm539_vm15, %vm540_vm14 }
 0x2e8   : > { %v536_v5 = vsub.f32 1.0, %v535_v4 }
 0x2ea   : > { %v537_v7 = vmul.f32 %v677_v3, %v536_v5 }
 0x2ec   : > { %v538_v9 = vadd.f32 %v677_v3, %v537_v7 }
 0x2ee   : > { %v542_v11 = vsel %vm541_vm0, %v677_v3, %v538_v9 }
 0x2ef   : > { %v547_v12 = vsel %vm544_vm1, %v546_v10, %v542_v11 }
 0x2f0   : > { %549 = vst [vmem:[#allocation7] sm:$0x1] %v547_v12 }
 0x2f1 PF: > { %p638_p8 = scmp.eq.s32.totalorder %s612_s8, 1  ;;  %s559_s17 = sshll.u32 %s872_s9, 4  ;;  %s560_s17 = int_to_ptr.hbm [resolvable:$true] %s559_s17 }
 0x2f2   : > { %s738_s18 = smov [#allocation7]  }
 0x2f3   : > { %s557_s19 = sshll.u32 %s738_s18, 4  ;;  %s558_s19 = int_to_ptr.vmem [resolvable:$true] %s557_s19 }
 0x2f4   : > { %635 = dma.vmem_to_hbm [thread:$0]  (%p638_p8), %s558_s19, 16, %s560_s17, [#allocation8]  }
 0x2f5   : > { %719 = dma.done.wait (%p638_p8), [#allocation8], 16  }
 0x2f6   : > { %721 = vsyncadd (%p638_p8), [#allocation8], 4294967280 }
 0x2f7 PF: > { %s22_s13 = sadd.s32 1, %s732_s13   ;;  %s873_s11 = smov %s728_s12 }
 0x2f8   : > { %p19_p9 = scmp.ge.s32.totalorder %s22_s13, 4   ;;  %s874_s12 = smov %s876_s14 }
 0x2fa   :  { %21 = sbr.rel (!%p19_p9) target bundleno = 5 (0x5), region = 100 }
 0x2ff   :  { %573 = vsyncpa [#allocation8], 1 }
 0x300   :  { %575 = vsyncpa [#allocation8 + $0x1], 1 }

</bundles_post_ra>
